<compile_context>
chip_gen: v7x
topology: tpu7x:2x2x1
jax: 0.10.0
libtpu: 0.0.40
codegen_flags: <defaults>
</compile_context>

<pallas_src>
import jax
import jax.numpy as jnp
import numpy as np
from jax.experimental import pallas as pl
from jax.experimental.pallas import tpu as pltpu


def _pos_embed_kernel(fi_ref, pos2_ref, o_ref):
    # fi_ref  : SMEM (batch,) int32               -- scalar-prefetched first-nonzero idx
    # pos2_ref: VMEM (2*seq_len, te) f32          -- [zeros(seq_len); pos[:seq_len]] tile
    # o_ref   : VMEM (tb, seq_len, te) f32        -- tb batch rows per grid step
    tb, seq_len, _ = o_ref.shape
    batch = fi_ref.shape[0]
    b0 = pl.program_id(1) * tb  # grid = (embed tiles, batch blocks)

    def body(r, carry):
        # Clamp for the (possibly partial) last batch block: the out-of-bounds
        # rows of this block are discarded on writeback, so any valid fi works.
        bi = jnp.minimum(b0 + r, batch - 1)
        fi = fi_ref[bi]
        # Rows [seq_len - fi, 2*seq_len - fi) of pos2 == fi zero rows followed by
        # pos[0 : seq_len - fi]  ->  exactly the PyTorch cat(zeros, kept_values).
        o_ref[r] = pos2_ref[pl.ds(seq_len - fi, seq_len), :]
        return carry

    jax.lax.fori_loop(0, tb, body, None, unroll=True)


def _choose_tiles(batch, seq_len, e_pad):
    """VMEM-byte-budget-driven (tb, te): te a multiple-of-128 divisor of e_pad."""
    lane = 128
    row_cap = 4 << 20     # cap on one (seq_len, te) f32 row block  (table block <= 8 MiB)
    block_cap = 8 << 20   # cap on one (tb, seq_len, te) f32 output block

    k = e_pad // lane
    te = lane
    for d in range(k, 0, -1):
        if k % d == 0 and seq_len * (d * lane) * 4 <= row_cap:
            te = d * lane
            break
    # TODO(synk): also tile the seq dimension when seq_len alone exceeds row_cap.

    row_bytes = seq_len * te * 4
    tb = max(1, min(16, batch, block_cap // max(row_bytes, 1)))
    # Keep >= 2 grid steps when possible so both v7x TensorCores get work.
    if e_pad // te == 1 and batch >= 2:
        tb = min(tb, max(1, batch // 2))
    return tb, te


def positional_embedding(x, pos):
    """x: (batch, seq_len) int32, pos: (block_size, n_embd) f32
       -> (batch, seq_len, n_embd) f32."""
    batch, seq_len = x.shape
    block_size, n_embd = pos.shape
    assert seq_len <= block_size

    # First nonzero index per row (computed once on the XLA side).
    nonzero = x != 0
    fi = jnp.argmax(nonzero, axis=1).astype(jnp.int32)
    # All-zero row: PyTorch would raise; we emit an all-zero output row
    # (fi -> seq_len selects only zero-padding rows below).
    fi = jnp.where(jnp.any(nonzero, axis=1), fi, jnp.int32(seq_len))

    # Pad the embedding dim to a lane-dense multiple of 128.
    e_pad = ((n_embd + 127) // 128) * 128
    pos_used = pos[:seq_len, :].astype(jnp.float32)
    if e_pad != n_embd:
        pos_used = jnp.pad(pos_used, ((0, 0), (0, e_pad - n_embd)))
    # Zero-padded table: rows [0, seq_len) are zeros, rows [seq_len, 2*seq_len)
    # are the (only) seq_len rows of pos that can ever be read.
    pos_table = jnp.concatenate(
        [jnp.zeros((seq_len, e_pad), jnp.float32), pos_used], axis=0)

    tb, te = _choose_tiles(batch, seq_len, e_pad)
    ne = e_pad // te
    nb = pl.cdiv(batch, tb)

    table_block_bytes = 2 * seq_len * te * 4
    out_block_bytes = tb * seq_len * te * 4
    # Conservative footprint (assume double-buffered table in the fallback path).
    needed = 2 * table_block_bytes + 2 * out_block_bytes + 4 * batch
    vmem_limit = int(min(needed + (8 << 20), 48 << 20))

    bytes_accessed = int(batch * seq_len * e_pad * 4       # output writes
                         + 2 * seq_len * e_pad * 4         # table read
                         + 4 * batch)                      # fi

    table_map = lambda e, b, fi_ref: (0, e)
    out_spec = pl.BlockSpec((tb, seq_len, te), lambda e, b, fi_ref: (b, 0, e))

    def _call(table_spec):
        return pl.pallas_call(
            _pos_embed_kernel,
            out_shape=jax.ShapeDtypeStruct((batch, seq_len, e_pad), jnp.float32),
            grid_spec=pltpu.PrefetchScalarGridSpec(
                num_scalar_prefetch=1,            # fi -> SMEM
                grid=(ne, nb),                    # batch innermost: table re-fetched only per e-slab
                in_specs=[table_spec],
                out_specs=out_spec,
            ),
            compiler_params=pltpu.CompilerParams(
                dimension_semantics=("parallel", "parallel"),
                vmem_limit_bytes=vmem_limit,
            ),
            cost_estimate=pl.CostEstimate(
                flops=0, transcendentals=0, bytes_accessed=bytes_accessed),
        )(fi, pos_table)

    try:
        # Single-buffer the constant-per-slab table block (halves its VMEM).
        out_padded = _call(pl.BlockSpec((2 * seq_len, te), table_map,
                                        pipeline_mode=pl.Buffered(1)))
    except Exception:
        # TODO(synk): drop this fallback once pl.Buffered(1) on the top-level
        # pipeline is guaranteed by the minimum supported jax version.
        out_padded = _call(pl.BlockSpec((2 * seq_len, te), table_map))

    if e_pad != n_embd:
        return out_padded[..., :n_embd]
    return out_padded


def _reference(x, pos):
    batch, seq_len = x.shape
    fi = jnp.argmax(x != 0, axis=1)  # first nonzero index per row
    t = jnp.arange(seq_len)
    outs = []
    for i in range(batch):
        src = jnp.clip(t - fi[i], 0, None)
        row = jnp.where((t[:, None] >= fi[i]), pos[src, :], 0.0)
        outs.append(row)
    return jnp.stack(outs, axis=0).astype(jnp.float32)


if __name__ == "__main__":
    key = jax.random.PRNGKey(0)
    k_tok, k_pos = jax.random.split(key)

    batch, seq_len = 2, 8
    block_size, n_embd = 16, 32

    # Deterministic inputs: nonzero tokens with a per-row leading run of zeros.
    tokens = jax.random.randint(k_tok, (batch, seq_len), 1, 50, dtype=jnp.int32)
    first_idx = jnp.array([3, 1], dtype=jnp.int32)
    lead_mask = jnp.arange(seq_len)[None, :] < first_idx[:, None]
    x = jnp.where(lead_mask, 0, tokens)

    # Module init is zeros; use deterministic random values so the test is non-trivial.
    pos = jax.random.normal(k_pos, (block_size, n_embd), dtype=jnp.float32)

    out = positional_embedding(x, pos)
    jax.block_until_ready(out)
    ref = _reference(x, pos)
    np.testing.assert_allclose(np.asarray(out), np.asarray(ref), rtol=1e-6, atol=1e-6)

    # Documented divergence from PyTorch: an all-zero row yields an all-zero
    # output row (PyTorch would raise on it).
    x_zero = x.at[0].set(0)
    out_zero = positional_embedding(x_zero, pos)
    jax.block_until_ready(out_zero)
    np.testing.assert_allclose(np.asarray(out_zero[0]), 0.0, atol=0.0)
    np.testing.assert_allclose(np.asarray(out_zero[1]),
                               np.asarray(_reference(x_zero, pos)[1]),
                               rtol=1e-6, atol=1e-6)

    # Exercise the general path: lane-multiple n_embd, batch not divisible by the
    # chosen row block (cdiv grid + clamped row index in the kernel).
    batch_b, n_embd_b = 5, 256
    k_tok_b, k_pos_b = jax.random.split(jax.random.PRNGKey(1))
    tokens_b = jax.random.randint(k_tok_b, (batch_b, seq_len), 1, 50, dtype=jnp.int32)
    first_b = jnp.array([0, 2, 7, 4, 1], dtype=jnp.int32)
    x_b = jnp.where(jnp.arange(seq_len)[None, :] < first_b[:, None], 0, tokens_b)
    pos_b = jax.random.normal(k_pos_b, (block_size, n_embd_b), dtype=jnp.float32)
    out_b = positional_embedding(x_b, pos_b)
    jax.block_until_ready(out_b)
    np.testing.assert_allclose(np.asarray(out_b), np.asarray(_reference(x_b, pos_b)),
                               rtol=1e-6, atol=1e-6)

    print("KERNEL_OK")
</pallas_src>

<mosaic_0001>
module attributes {stable_mosaic.version = 11 : i64} {
  func.func @_pos_embed_kernel(%arg0: i32, %arg1: i32, %arg2: memref<2xi32, #tpu.memory_space<smem>>, %arg3: memref<16x128xf32, #tpu.memory_space<vmem>>, %arg4: memref<1x8x128xf32, #tpu.memory_space<vmem>>) attributes {dimension_semantics = [#tpu.dimension_semantics<parallel>, #tpu.dimension_semantics<parallel>], iteration_bounds = array<i64: 1, 2>, scalar_prefetch = 1 : i64, scratch_operands = 0 : i64, tpu.core_type = #tpu.core_type<tc>, window_params = [{pipeline_mode = #tpu.pipeline_mode<synchronous>, transform_indices = @transform_0, window_bounds = array<i64: 16, 128>}, {transform_indices = @transform_1, window_bounds = array<i64: 1, 8, 128>}]} {
    %c1_i32 = arith.constant 1 : i32
    %0 = arith.muli %arg1, %c1_i32 : i32
    %c0_i32 = arith.constant 0 : i32
    %1 = arith.addi %0, %c0_i32 : i32
    %c1_i32_0 = arith.constant 1 : i32
    %2 = arith.minsi %1, %c1_i32_0 : i32
    %3 = arith.index_cast %2 : i32 to index
    %4 = memref.load %arg2[%3] : memref<2xi32, #tpu.memory_space<smem>>
    %c8_i32 = arith.constant 8 : i32
    %5 = arith.subi %c8_i32, %4 : i32
    %6 = arith.index_cast %5 : i32 to index
    %c0 = arith.constant 0 : index
    %7 = vector.load %arg3[%6, %c0] : memref<16x128xf32, #tpu.memory_space<vmem>>, vector<8x128xf32>
    %8 = arith.index_cast %c0_i32 : i32 to index
    %c0_1 = arith.constant 0 : index
    %c0_2 = arith.constant 0 : index
    %9 = vector.load %arg4[%8, %c0_1, %c0_2] : memref<1x8x128xf32, #tpu.memory_space<vmem>>, vector<1x8x128xf32>
    %10 = vector.shape_cast %9 : vector<1x8x128xf32> to vector<8x128xf32>
    %11 = vector.shape_cast %7 : vector<8x128xf32> to vector<1x8x128xf32>
    tpu.vector_store %arg4[%8, %c0_1, %c0_2], %11 {strides = array<i32>} : memref<1x8x128xf32, #tpu.memory_space<vmem>>, vector<1x8x128xf32>,
    %c1_i32_3 = arith.constant 1 : i32
    return
  }
  func.func @transform_0(%arg0: i32, %arg1: i32, %arg2: memref<2xi32, #tpu.memory_space<smem>>) -> (i32, i32) {
    %c0_i32 = arith.constant 0 : i32
    %c0_i32_0 = arith.constant 0 : i32
    return %c0_i32, %arg0 : i32, i32
  }
  func.func @transform_1(%arg0: i32, %arg1: i32, %arg2: memref<2xi32, #tpu.memory_space<smem>>) -> (i32, i32, i32) {
    %c0_i32 = arith.constant 0 : i32
    %c0_i32_0 = arith.constant 0 : i32
    return %arg1, %c0_i32, %arg0 : i32, i32, i32
  }
}

module attributes {stable_mosaic.version = 11 : i64} {
  func.func @_pos_embed_kernel(%arg0: i32, %arg1: i32, %arg2: memref<2xi32, #tpu.memory_space<smem>>, %arg3: memref<16x128xf32, #tpu.memory_space<vmem>>, %arg4: memref<1x8x128xf32, #tpu.memory_space<vmem>>) attributes {dimension_semantics = [#tpu.dimension_semantics<parallel>, #tpu.dimension_semantics<parallel>], iteration_bounds = array<i64: 1, 2>, scalar_prefetch = 1 : i64, scratch_operands = 0 : i64, tpu.core_type = #tpu.core_type<tc>, window_params = [{transform_indices = @transform_0, window_bounds = array<i64: 16, 128>}, {transform_indices = @transform_1, window_bounds = array<i64: 1, 8, 128>}]} {
    %c1_i32 = arith.constant 1 : i32
    %0 = arith.muli %arg1, %c1_i32 : i32
    %c0_i32 = arith.constant 0 : i32
    %1 = arith.addi %0, %c0_i32 : i32
    %c1_i32_0 = arith.constant 1 : i32
    %2 = arith.minsi %1, %c1_i32_0 : i32
    %3 = arith.index_cast %2 : i32 to index
    %4 = memref.load %arg2[%3] : memref<2xi32, #tpu.memory_space<smem>>
    %c8_i32 = arith.constant 8 : i32
    %5 = arith.subi %c8_i32, %4 : i32
    %6 = arith.index_cast %5 : i32 to index
    %c0 = arith.constant 0 : index
    %7 = vector.load %arg3[%6, %c0] : memref<16x128xf32, #tpu.memory_space<vmem>>, vector<8x128xf32>
    %8 = arith.index_cast %c0_i32 : i32 to index
    %c0_1 = arith.constant 0 : index
    %c0_2 = arith.constant 0 : index
    %9 = vector.load %arg4[%8, %c0_1, %c0_2] : memref<1x8x128xf32, #tpu.memory_space<vmem>>, vector<1x8x128xf32>
    %10 = vector.shape_cast %9 : vector<1x8x128xf32> to vector<8x128xf32>
    %11 = vector.shape_cast %7 : vector<8x128xf32> to vector<1x8x128xf32>
    tpu.vector_store %arg4[%8, %c0_1, %c0_2], %11 {strides = array<i32>} : memref<1x8x128xf32, #tpu.memory_space<vmem>>, vector<1x8x128xf32>,
    %c1_i32_3 = arith.constant 1 : i32
    return
  }
  func.func @transform_0(%arg0: i32, %arg1: i32, %arg2: memref<2xi32, #tpu.memory_space<smem>>) -> (i32, i32) {
    %c0_i32 = arith.constant 0 : i32
    %c0_i32_0 = arith.constant 0 : i32
    return %c0_i32, %arg0 : i32, i32
  }
  func.func @transform_1(%arg0: i32, %arg1: i32, %arg2: memref<2xi32, #tpu.memory_space<smem>>) -> (i32, i32, i32) {
    %c0_i32 = arith.constant 0 : i32
    %c0_i32_0 = arith.constant 0 : i32
    return %arg1, %c0_i32, %arg0 : i32, i32, i32
  }
}

</mosaic_0001>

<bundles_post_ra>
// kernel: tpu_custom_call.1
= control target key start
LH: loop header
LB: loop body
LE: loop exit
PB: predicated region body
PF: predicated region fallthrough
CT: control target
= control target key end

     0   :  { %s612_s0 = inlined_call_operand.hbm [shape: s32[2], index: 0, kind: input, shape index: {}]   ;;  %s613_s1 = inlined_call_operand.hbm [shape: f32[16,128], index: 1, kind: input, shape index: {}]   ;;  %s614_s2 = inlined_call_operand.hbm [shape: f32[2,8,128], index: 2, kind: output, shape index: {}]  }
   0x1   :  { %s309_s11 = scalar_lea.hbm %s612_s0, 16 }
   0x2   :  { %p310_p0 = scmp.ne.s32.totalorder %s612_s0, %s309_s11  ;;  %p313_p1 = scmp.lt.u32.totalorder %s309_s11, %s612_s0 }
   0x4   :  { %p315_p2 = pnand %p313_p1, %p310_p0 }
   0x6   :  { %318 = shalt.err (!%p315_p2)  }
   0x7   :  { %s433_s16 = smov [#allocation3]  }
   0x8   :  { %8 = dma.hbm_to_smem %s612_s0, 16, %s433_s16, [#allocation2] }
   0x9   :  { %399 = dma.done.wait [#allocation2], 16 }
   0xa   :  { %400 = vsyncadd [#allocation2], 4294967280 }
   0xb   :  { %10 = sfence }
   0xc   :  { %11 = vsyncpa [#allocation5], 0 }
   0xd   :  { %12 = vsyncpa [#allocation6], 0 }
   0xe   :  { %14 = vsyncpa [#allocation6 + $0x1], 0  ;;  %s465_s19 = smov 0   ;;  %s467_s20 = smov 0  }
   0xf   :  { %s469_s21 = smov 0   ;;  %s471_s22 = smov 0  }
  0x10   :  { %s473_s23 = smov 0   ;;  %s475_s24 = smov 0  }
  0x11 LB: > { %s229_s0 = sadd.s32 4294967295, %s431_s24   ;;  %s230_s25 = sadd.s32 4294967294, %s431_s24   ;;  %s431_s24 = sphi %s475_s24, %s20_s24   ;;  %s427_s23 = sphi %s473_s23, %s632_s23   ;;  %s423_s22 = sphi %s471_s22, %s631_s22   ;;  %s419_s21 = sphi %s469_s21, %s630_s21   ;;  %s415_s20 = sphi %s467_s20, %s629_s20   ;;  %s411_s19 = sphi %s465_s19, %s628_s19  }
  0x12   : > { %s29_s26 = sadd.s32 1, %s427_s23  ;;  %s67_s27 = sadd.s32 1, %s419_s21 }
  0x13   : > { %p30_p3 = scmp.ge.s32.totalorder %s29_s26, 2  ;;  %p77_p4 = scmp.ne.s32.totalorder %s419_s21, %s415_s20 }
  0x14   : > { %p78_p5 = scmp.eq.s32.totalorder %s229_s0, 1  ;;  %p83_p6 = scmp.ne.s32.totalorder %s415_s20, %s411_s19 }
  0x15   : > { %s634_s26 = smov (%p30_p3, %s29_s26), 0  ;;  %p84_p8 = scmp.eq.s32.totalorder %s230_s25, 1 }
  0x16   : > { %p505_p7 = por %p78_p5, %p77_p4  ;;  %s62_s29 = ssub.s32 %s427_s23, %s634_s26 }
  0x17   : > { %p231_p9 = scmp.ge.s32.totalorder %s431_s24, 1  ;;  %p65_p10 = scmp.eq.s32.totalorder %s62_s29, 0 }
  0x18   : > { %s619_s28 = scalar_select %p505_p7, 1, 0 }
  0x19   : > { %p512_p11 = por %p84_p8, %p83_p6  ;;  %p91_p12 = scmp.lt.s32.totalorder %s431_s24, 3 }
  0x1a   : > { %s518_s3 = scalar_select %p65_p10, %s419_s21, %s67_s27  }
  0x1b   : > { %s620_s30 = scalar_select %p512_p11, 1, 0 }
  0x1c   : > { %p520_p13 = pnand %p231_p9, %p91_p12  ;;  %p524_p0 = scmp.eq.s32.totalorder %s229_s0, 0 }
  0x1d   : > { %s434_s6 = smov [#allocation4]   ;;  %s319_s11 = scalar_lea.hbm %s613_s1, 256 }
  0x1e   : > { %s621_s4 = scalar_select %p520_p13, 1, 0 }
  0x1f   : > { %s622_s5 = scalar_select %p524_p0, 1, 0 }
  0x20   : > { %p246_p1 = pneg %p520_p13  ;;  %s105_s7 = sshll.u32 %s434_s6, 4  ;;  %s106_s7 = int_to_ptr.vmem [resolvable:$true] %s105_s7 }
  0x21   : > { %p320_p3 = scmp.ne.s32.totalorder %s613_s1, %s319_s11  ;;  %p326_p8 = scmp.lt.u32.totalorder %s319_s11, %s613_s1 }
  0x22   : > { %p532_p2 = pnand %p524_p0, %p246_p1 }
  0x24   : > { %p321_p4 = pneg %p532_p2 }
  0x26   : > { %p322_p5 = pnand %p321_p4, %p320_p3 }
  0x28   : > { %p323_p6 = pneg %p322_p5 }
  0x2a   : > { %p328_p9 = pnand %p326_p8, %p323_p6 }
  0x2c   : > { %331 = shalt.err (!%p328_p9)
}
  0x2d   : > { %s332_s16 = scalar_lea.vmem %s106_s7, 256  ;;  %p340_p11 = scmp.lt.s32.totalorder %s106_s7, %s106_s7 }
  0x2e   : > { %p333_p10 = scmp.ne.s32.totalorder %s106_s7, %s332_s16  ;;  %p341_p7 = scmp.lt.s32.totalorder %s332_s16, %s332_s16 }
  0x30   : > { %p335_p12 = pnand %p333_p10, %p321_p4  ;;  %p342_p0 = por %p341_p7, %p340_p11 }
  0x32   : > { %p336_p1 = pneg %p335_p12 }
  0x34   : > { %p343_p13 = pnand %p342_p0, %p336_p1 }
  0x36   : > { %346 = shalt.err (!%p343_p13)
}
  0x37   : > { %s435_s17 = smov 128   ;;  %s436_s18 = smov 8  }
  0x38   : > { %249 = dma.hbm_to_vmem [thread:$0]  (!%p532_p2), %s613_s1, 256, %s106_s7, [#allocation5], %s435_s17, %s435_s17, %s436_s18  }
  0x39   : > { %p624_p3 = scmp.ne.s32.totalorder %s621_s4, 0 }
  0x3a   : > { %p625_p5 = scmp.ne.s32.totalorder (!%p624_p3), %s622_s5, 0 }
  0x3b   : > { %121 = sbr.rel (%p624_p3) target bundleno = 97 (0x61), region = 24 }
  0x42   : > { %402 = dma.done.wait (%p625_p5), [#allocation5], 256  }
  0x43   : > { %404 = vsyncadd (%p625_p5), [#allocation5], 4294967040  ;;  %p136_p7 = scmp.lt.s32.totalorder %s423_s22, 1  ;;  %s133_s27 = sand.u32 1, %s415_s20  }
  0x44   : > { %s235_s29 = sshll.u32 %s133_s27, 3  ;;  %s237_s4 = sshll.u32 %s423_s22, 7 }
  0x45   : > { %s137_s6 = scalar_select %p136_p7, %s423_s22, 1 }
  0x46   : > { %s135_s7 = scalar_lea.vmem [#allocation7], %s235_s29  ;;  %s567_s5 = scalar_lea.hbm %s614_s2, %s237_s4 }
  0x47   : > { %s138_s8 = sld [smem:[#allocation3 + %s137_s6]]  ;;  %s158_s9 = sshll.u32 %s135_s7, 4  ;;  %s562_s9 = int_to_ptr.vmem [resolvable:$true] %s158_s9 }
  0x48   : > { %s144_s14 = scalar_lea.sflag [#allocation6], %s133_s27  ;;  %s347_s15 = scalar_lea.vmem %s562_s9, 128 }
  0x49   : > { %p348_p11 = scmp.ne.s32.totalorder %s562_s9, %s347_s15  ;;  %p626_p13 = scmp.ne.s32.totalorder %s619_s28, 0 }
  0x4a   : > { %s437_s22 = smov [#allocation7]  }
  0x4b   : > { %p349_p0 = pnand %p348_p11, %p626_p13  ;;  %s351_s16 = sshll.u32 %s437_s22, 4  ;;  %s352_s16 = int_to_ptr.vmem [resolvable:$false] %s351_s16 }
  0x4c   : > { %s353_s17 = scalar_lea.vmem %s352_s16, 256  ;;  %p354_p4 = scmp.lt.s32.totalorder %s562_s9, %s352_s16 }
  0x4d   : > { %s139_s10 = ssub.s32 8, %s138_s8  ;;  %p350_p2 = pneg %p349_p0 }
  0x4e   : > { %s140_s13 = scalar_lea.vmem [#allocation4], %s139_s10  ;;  %p355_p6 = scmp.lt.s32.totalorder %s353_s17, %s347_s15 }
  0x4f   : > { %v141_v0 = vld [vmem:[%s140_s13] sm:$0xff] }
  0x50   : > { %142 = vst [vmem:[%s135_s7] sm:$0xff] %v141_v0  ;;  %p356_p8 = por %p355_p6, %p354_p4 }
  0x52   : > { %p357_p9 = pnand %p356_p8, %p350_p2 }
  0x54   : > { %360 = shalt.err (!%p357_p9)
}
  0x55   : > { %s361_s18 = scalar_lea.hbm %s567_s5, 128  ;;  %s365_s27 = scalar_lea.hbm %s614_s2, 256 }
  0x56   : > { %p362_p10 = scmp.ne.s32.totalorder %s567_s5, %s361_s18  ;;  %p366_p3 = scmp.lt.u32.totalorder %s567_s5, %s614_s2 }
  0x57   : > { %p367_p5 = scmp.lt.u32.totalorder %s365_s27, %s361_s18  ;;  %p369_p11 = scmp.lt.u32.totalorder %s361_s18, %s567_s5 }
  0x58   : > { %p363_p12 = pnand %p362_p10, %p626_p13 }
  0x59   : > { %p368_p7 = por %p367_p5, %p366_p3 }
  0x5a   : > { %p364_p1 = pneg %p363_p12 }
  0x5b   : > { %p370_p0 = por %p369_p11, %p368_p7 }
  0x5d   : > { %p371_p2 = pnand %p370_p0, %p364_p1 }
  0x5f   : > { %374 = shalt.err (!%p371_p2)
}
  0x60   : > { %244 = dma.vmem_to_hbm [thread:$0]  (%p626_p13), %s562_s9, 128, %s567_s5, %s144_s14  }
  0x61 PF: > { %p256_p4 = scmp.ge.s32.totalorder %s431_s24, 2  ;;  %s170_s8 = sand.u32 1, %s411_s19  }
  0x62   : > { %p627_p6 = scmp.ne.s32.totalorder %s620_s30, 0  ;;  %s171_s7 = scalar_lea.sflag [#allocation6], %s170_s8 }
  0x64   : > { %p251_p8 = pnand %p256_p4, %p627_p6 }
  0x66   : > { %406 = dma.done.wait (!%p251_p8), %s171_s7, 128  }
  0x67   : > { %408 = vsyncadd (!%p251_p8), %s171_s7, 4294967168  ;;  %s20_s24 = sadd.s32 1, %s431_s24   ;;  %s628_s19 = smov %s415_s20 }
  0x68   : > { %p17_p9 = scmp.ge.s32.totalorder %s20_s24, 4   ;;  %s629_s20 = smov %s419_s21 }
  0x69   : > { %s630_s21 = smov %s518_s3  ;;  %s631_s22 = smov %s427_s23 }
  0x6a   : > { %s632_s23 = smov %s634_s26  ;;  %19 = sbr.rel (!%p17_p9) target bundleno = 17 (0x11), region = 63 }
  0x71   :  { %176 = vsyncpa [#allocation5], 1 }
  0x72   :  { %178 = vsyncpa [#allocation5 + $0x1], 1 }
  0x73   :  { %179 = vsyncpa [#allocation6], 1 }
  0x74   :  { %181 = vsyncpa [#allocation6 + $0x1], 1 }

// kernel: tpu_custom_call.1
= control target key start
LH: loop header
LB: loop body
LE: loop exit
PB: predicated region body
PF: predicated region fallthrough
CT: control target
= control target key end

     0   :  { %s612_s0 = inlined_call_operand.hbm [shape: s32[2], index: 0, kind: input, shape index: {}]   ;;  %s613_s1 = inlined_call_operand.hbm [shape: f32[16,128], index: 1, kind: input, shape index: {}]   ;;  %s614_s2 = inlined_call_operand.hbm [shape: f32[2,8,128], index: 2, kind: output, shape index: {}]  }
   0x1   :  { %s309_s11 = scalar_lea.hbm %s612_s0, 16 }
   0x2   :  { %p310_p0 = scmp.ne.s32.totalorder %s612_s0, %s309_s11  ;;  %p313_p1 = scmp.lt.u32.totalorder %s309_s11, %s612_s0 }
   0x4   :  { %p315_p2 = pnand %p313_p1, %p310_p0 }
   0x6   :  { %318 = shalt.err (!%p315_p2)  }
   0x7   :  { %s433_s16 = smov [#allocation3]  }
   0x8   :  { %8 = dma.hbm_to_smem %s612_s0, 16, %s433_s16, [#allocation2] }
   0x9   :  { %399 = dma.done.wait [#allocation2], 16 }
   0xa   :  { %400 = vsyncadd [#allocation2], 4294967280 }
   0xb   :  { %10 = sfence }
   0xc   :  { %11 = vsyncpa [#allocation5], 0 }
   0xd   :  { %12 = vsyncpa [#allocation6], 0 }
   0xe   :  { %14 = vsyncpa [#allocation6 + $0x1], 0  ;;  %s465_s19 = smov 0   ;;  %s467_s20 = smov 0  }
   0xf   :  { %s469_s21 = smov 0   ;;  %s471_s22 = smov 0  }
  0x10   :  { %s473_s23 = smov 0   ;;  %s475_s24 = smov 0  }
  0x11 LB: > { %s229_s0 = sadd.s32 4294967295, %s431_s24   ;;  %s230_s25 = sadd.s32 4294967294, %s431_s24   ;;  %s431_s24 = sphi %s475_s24, %s20_s24   ;;  %s427_s23 = sphi %s473_s23, %s632_s23   ;;  %s423_s22 = sphi %s471_s22, %s631_s22   ;;  %s419_s21 = sphi %s469_s21, %s630_s21   ;;  %s415_s20 = sphi %s467_s20, %s629_s20   ;;  %s411_s19 = sphi %s465_s19, %s628_s19  }
  0x12   : > { %s29_s26 = sadd.s32 1, %s427_s23  ;;  %s67_s27 = sadd.s32 1, %s419_s21 }
  0x13   : > { %p30_p3 = scmp.ge.s32.totalorder %s29_s26, 2  ;;  %p77_p4 = scmp.ne.s32.totalorder %s419_s21, %s415_s20 }
  0x14   : > { %p78_p5 = scmp.eq.s32.totalorder %s229_s0, 1  ;;  %p83_p6 = scmp.ne.s32.totalorder %s415_s20, %s411_s19 }
  0x15   : > { %s634_s26 = smov (%p30_p3, %s29_s26), 0  ;;  %p84_p8 = scmp.eq.s32.totalorder %s230_s25, 1 }
  0x16   : > { %p505_p7 = por %p78_p5, %p77_p4  ;;  %s62_s29 = ssub.s32 %s427_s23, %s634_s26 }
  0x17   : > { %p231_p9 = scmp.ge.s32.totalorder %s431_s24, 1  ;;  %p65_p10 = scmp.eq.s32.totalorder %s62_s29, 0 }
  0x18   : > { %s619_s28 = scalar_select %p505_p7, 1, 0 }
  0x19   : > { %p512_p11 = por %p84_p8, %p83_p6  ;;  %p91_p12 = scmp.lt.s32.totalorder %s431_s24, 3 }
  0x1a   : > { %s518_s3 = scalar_select %p65_p10, %s419_s21, %s67_s27  }
  0x1b   : > { %s620_s30 = scalar_select %p512_p11, 1, 0 }
  0x1c   : > { %p520_p13 = pnand %p231_p9, %p91_p12  ;;  %p524_p0 = scmp.eq.s32.totalorder %s229_s0, 0 }
  0x1d   : > { %s434_s6 = smov [#allocation4]   ;;  %s319_s11 = scalar_lea.hbm %s613_s1, 256 }
  0x1e   : > { %s621_s4 = scalar_select %p520_p13, 1, 0 }
  0x1f   : > { %s622_s5 = scalar_select %p524_p0, 1, 0 }
  0x20   : > { %p246_p1 = pneg %p520_p13  ;;  %s105_s7 = sshll.u32 %s434_s6, 4  ;;  %s106_s7 = int_to_ptr.vmem [resolvable:$true] %s105_s7 }
  0x21   : > { %p320_p3 = scmp.ne.s32.totalorder %s613_s1, %s319_s11  ;;  %p326_p8 = scmp.lt.u32.totalorder %s319_s11, %s613_s1 }
  0x22   : > { %p532_p2 = pnand %p524_p0, %p246_p1 }
  0x24   : > { %p321_p4 = pneg %p532_p2 }
  0x26   : > { %p322_p5 = pnand %p321_p4, %p320_p3 }
  0x28   : > { %p323_p6 = pneg %p322_p5 }
  0x2a   : > { %p328_p9 = pnand %p326_p8, %p323_p6 }
  0x2c   : > { %331 = shalt.err (!%p328_p9)
}
  0x2d   : > { %s332_s16 = scalar_lea.vmem %s106_s7, 256  ;;  %p340_p11 = scmp.lt.s32.totalorder %s106_s7, %s106_s7 }
  0x2e   : > { %p333_p10 = scmp.ne.s32.totalorder %s106_s7, %s332_s16  ;;  %p341_p7 = scmp.lt.s32.totalorder %s332_s16, %s332_s16 }
  0x30   : > { %p335_p12 = pnand %p333_p10, %p321_p4  ;;  %p342_p0 = por %p341_p7, %p340_p11 }
  0x32   : > { %p336_p1 = pneg %p335_p12 }
  0x34   : > { %p343_p13 = pnand %p342_p0, %p336_p1 }
  0x36   : > { %346 = shalt.err (!%p343_p13)
}
  0x37   : > { %s435_s17 = smov 128   ;;  %s436_s18 = smov 8  }
  0x38   : > { %249 = dma.hbm_to_vmem [thread:$0]  (!%p532_p2), %s613_s1, 256, %s106_s7, [#allocation5], %s435_s17, %s435_s17, %s436_s18  }
  0x39   : > { %p624_p3 = scmp.ne.s32.totalorder %s621_s4, 0 }
  0x3a   : > { %p625_p5 = scmp.ne.s32.totalorder (!%p624_p3), %s622_s5, 0 }
  0x3b   : > { %121 = sbr.rel (%p624_p3) target bundleno = 97 (0x61), region = 24 }
  0x42   : > { %402 = dma.done.wait (%p625_p5), [#allocation5], 256  }
  0x43   : > { %404 = vsyncadd (%p625_p5), [#allocation5], 4294967040  ;;  %p136_p7 = scmp.lt.s32.totalorder %s423_s22, 1  ;;  %s133_s27 = sand.u32 1, %s415_s20  }
  0x44   : > { %s235_s29 = sshll.u32 %s133_s27, 3  ;;  %s237_s4 = sshll.u32 %s423_s22, 7 }
  0x45   : > { %s137_s6 = scalar_select %p136_p7, %s423_s22, 1 }
  0x46   : > { %s135_s7 = scalar_lea.vmem [#allocation7], %s235_s29  ;;  %s567_s5 = scalar_lea.hbm %s614_s2, %s237_s4 }
  0x47   : > { %s138_s8 = sld [smem:[#allocation3 + %s137_s6]]  ;;  %s158_s9 = sshll.u32 %s135_s7, 4  ;;  %s562_s9 = int_to_ptr.vmem [resolvable:$true] %s158_s9 }
  0x48   : > { %s144_s14 = scalar_lea.sflag [#allocation6], %s133_s27  ;;  %s347_s15 = scalar_lea.vmem %s562_s9, 128 }
  0x49   : > { %p348_p11 = scmp.ne.s32.totalorder %s562_s9, %s347_s15  ;;  %p626_p13 = scmp.ne.s32.totalorder %s619_s28, 0 }
  0x4a   : > { %s437_s22 = smov [#allocation7]  }
  0x4b   : > { %p349_p0 = pnand %p348_p11, %p626_p13  ;;  %s351_s16 = sshll.u32 %s437_s22, 4  ;;  %s352_s16 = int_to_ptr.vmem [resolvable:$false] %s351_s16 }
  0x4c   : > { %s353_s17 = scalar_lea.vmem %s352_s16, 256  ;;  %p354_p4 = scmp.lt.s32.totalorder %s562_s9, %s352_s16 }
  0x4d   : > { %s139_s10 = ssub.s32 8, %s138_s8  ;;  %p350_p2 = pneg %p349_p0 }
  0x4e   : > { %s140_s13 = scalar_lea.vmem [#allocation4], %s139_s10  ;;  %p355_p6 = scmp.lt.s32.totalorder %s353_s17, %s347_s15 }
  0x4f   : > { %v141_v0 = vld [vmem:[%s140_s13] sm:$0xff] }
  0x50   : > { %142 = vst [vmem:[%s135_s7] sm:$0xff] %v141_v0  ;;  %p356_p8 = por %p355_p6, %p354_p4 }
  0x52   : > { %p357_p9 = pnand %p356_p8, %p350_p2 }
  0x54   : > { %360 = shalt.err (!%p357_p9)
}
  0x55   : > { %s361_s18 = scalar_lea.hbm %s567_s5, 128  ;;  %s365_s27 = scalar_lea.hbm %s614_s2, 256 }
  0x56   : > { %p362_p10 = scmp.ne.s32.totalorder %s567_s5, %s361_s18  ;;  %p366_p3 = scmp.lt.u32.totalorder %s567_s5, %s614_s2 }
  0x57   : > { %p367_p5 = scmp.lt.u32.totalorder %s365_s27, %s361_s18  ;;  %p369_p11 = scmp.lt.u32.totalorder %s361_s18, %s567_s5 }
  0x58   : > { %p363_p12 = pnand %p362_p10, %p626_p13 }
  0x59   : > { %p368_p7 = por %p367_p5, %p366_p3 }
  0x5a   : > { %p364_p1 = pneg %p363_p12 }
  0x5b   : > { %p370_p0 = por %p369_p11, %p368_p7 }
  0x5d   : > { %p371_p2 = pnand %p370_p0, %p364_p1 }
  0x5f   : > { %374 = shalt.err (!%p371_p2)
}
  0x60   : > { %244 = dma.vmem_to_hbm [thread:$0]  (%p626_p13), %s562_s9, 128, %s567_s5, %s144_s14  }
  0x61 PF: > { %p256_p4 = scmp.ge.s32.totalorder %s431_s24, 2  ;;  %s170_s8 = sand.u32 1, %s411_s19  }
  0x62   : > { %p627_p6 = scmp.ne.s32.totalorder %s620_s30, 0  ;;  %s171_s7 = scalar_lea.sflag [#allocation6], %s170_s8 }
  0x64   : > { %p251_p8 = pnand %p256_p4, %p627_p6 }
  0x66   : > { %406 = dma.done.wait (!%p251_p8), %s171_s7, 128  }
  0x67   : > { %408 = vsyncadd (!%p251_p8), %s171_s7, 4294967168  ;;  %s20_s24 = sadd.s32 1, %s431_s24   ;;  %s628_s19 = smov %s415_s20 }
  0x68   : > { %p17_p9 = scmp.ge.s32.totalorder %s20_s24, 4   ;;  %s629_s20 = smov %s419_s21 }
  0x69   : > { %s630_s21 = smov %s518_s3  ;;  %s631_s22 = smov %s427_s23 }
  0x6a   : > { %s632_s23 = smov %s634_s26  ;;  %19 = sbr.rel (!%p17_p9) target bundleno = 17 (0x11), region = 63 }
  0x71   :  { %176 = vsyncpa [#allocation5], 1 }
  0x72   :  { %178 = vsyncpa [#allocation5 + $0x1], 1 }
  0x73   :  { %179 = vsyncpa [#allocation6], 1 }
  0x74   :  { %181 = vsyncpa [#allocation6 + $0x1], 1 }

</bundles_post_ra>
